<compile_context>
chip_gen: v7x
topology: tpu7x:2x2x1
jax: 0.10.0
libtpu: 0.0.40
codegen_flags: <defaults>
</compile_context>

<pallas_src>
import functools

import jax
import jax.numpy as jnp
from jax.experimental import pallas as pl
from jax.experimental.pallas import tpu as pltpu

EPS = 1e-5


def _pred_kernel(x_ref, w_ref, b_ref, c_ref, out_ref):
    # x_ref : (TILE_R, G*E)  G items' embeddings per lane-dense row (streamed)
    # w_ref : (G*E, G)       block-diagonal folded-BN weight (grid-resident)
    # b_ref : (TILE_R, G)    item_bias regrouped to match x rows (streamed)
    # c_ref : (1, 1) SMEM    folded scalar constant (user-BN shift dot + bias)
    # out   : (TILE_R, G)    out[r, g] = pred[item G*r + g]
    out_ref[...] = (
        jnp.dot(x_ref[...], w_ref[...], preferred_element_type=jnp.float32)
        + b_ref[...]
        + c_ref[0, 0]
    )


def _fold_bn(params):
    """Fold user BN, item BN (eval mode) and the scalar bias into (w, c)."""
    u_inv = jax.lax.rsqrt(params["user_bn_var"] + EPS)
    u_norm = (params["user_emb"] - params["user_bn_mean"]) * u_inv \
        * params["user_bn_gamma"] + params["user_bn_beta"]                # (1, E)
    i_inv = jax.lax.rsqrt(params["item_bn_var"] + EPS)
    i_scale = params["item_bn_gamma"] * i_inv                             # (1, E)
    i_shift = params["item_bn_beta"] - params["item_bn_mean"] * i_scale   # (1, E)
    w = (u_norm * i_scale).reshape(-1)                                    # (E,)
    c = jnp.sum(u_norm * i_shift) + params["bias"][0]                     # scalar
    return w, c


def prediction_model_forward(params, item_emb, item_bias, *,
                             tile_rows=4096, min_pallas_items=16384,
                             force_pallas=False):
    """params: dict of model parameters; item_emb (N, E) f32; item_bias (N,) f32."""
    N, E = item_emb.shape
    w, c = _fold_bn(params)

    # Small-N fast path: fused XLA reads the data once; a custom call + layout
    # plumbing is pure overhead at these sizes.
    if not force_pallas and N < min_pallas_items:
        return item_emb @ w + c + item_bias

    # Free row-major regrouping: (N, E) -> (N//G, G*E) with G*E == 128 when
    # possible (lane-dense rows, no HBM copy).  Otherwise fall back to G = 1
    # (rows as-is; lanes under-filled but still a single pass over HBM).
    if E <= 128 and 128 % E == 0 and N % (128 // E) == 0:
        G = 128 // E
    else:
        G = 1

    n_rows = N // G
    x2 = item_emb.reshape(n_rows, G * E)            # free reshape
    b2 = item_bias.reshape(n_rows, G)               # free reshape
    c2 = c.astype(jnp.float32).reshape(1, 1)        # scalar -> SMEM

    # Block-diagonal weight: W[g*E + e, g'] = (g == g') * w[e]
    W = (jnp.eye(G, dtype=jnp.float32)[:, None, :]
         * w.astype(jnp.float32)[None, :, None]).reshape(G * E, G)

    # ~2 MiB x-tiles; full-array block for small inputs (always a legal block
    # since the dims then equal the array dims).  Non-divisible last blocks are
    # handled by Pallas' masked partial writes — no pad of the big array.
    tile_r = n_rows if n_rows <= tile_rows else tile_rows
    grid = (pl.cdiv(n_rows, tile_r),)

    out2 = pl.pallas_call(
        _pred_kernel,
        out_shape=jax.ShapeDtypeStruct((n_rows, G), jnp.float32),
        grid=grid,
        in_specs=[
            pl.BlockSpec((tile_r, G * E), lambda i: (i, 0)),     # item rows (streamed)
            pl.BlockSpec((G * E, G), lambda i: (0, 0)),          # folded weight (resident)
            pl.BlockSpec((tile_r, G), lambda i: (i, 0)),         # item_bias (streamed)
            pl.BlockSpec(memory_space=pltpu.MemorySpace.SMEM),   # scalar c
        ],
        out_specs=pl.BlockSpec((tile_r, G), lambda i: (i, 0)),
        compiler_params=pltpu.CompilerParams(
            dimension_semantics=("parallel",),        # shards rows across v7x's 2 TCs
            vmem_limit_bytes=32 * 1024 * 1024,        # ~12 MiB used; safe on v5e/v6e/v7x
        ),
    )(x2, W, b2, c2)

    return out2.reshape(N)                            # free reshape back to (N,)


def init_params(key, emb_size):
    ks = jax.random.split(key, 8)
    # user_emb ~ N(0, 0.05), bias = 0 (as in the PyTorch __init__)
    user_emb = 0.05 * jax.random.normal(ks[0], (1, emb_size), jnp.float32)
    bias = jnp.zeros((1,), jnp.float32)
    # BatchNorm1d params (perturbed so the BN math is actually exercised)
    return {
        "user_emb": user_emb,
        "bias": bias,
        "user_bn_gamma": 1.0 + 0.1 * jax.random.normal(ks[1], (1, emb_size), jnp.float32),
        "user_bn_beta": 0.05 * jax.random.normal(ks[2], (1, emb_size), jnp.float32),
        "user_bn_mean": 0.02 * jax.random.normal(ks[3], (1, emb_size), jnp.float32),
        "user_bn_var": 1.0 + 0.1 * jnp.abs(jax.random.normal(ks[4], (1, emb_size), jnp.float32)),
        "item_bn_gamma": 1.0 + 0.1 * jax.random.normal(ks[5], (1, emb_size), jnp.float32),
        "item_bn_beta": 0.05 * jax.random.normal(ks[6], (1, emb_size), jnp.float32),
        "item_bn_mean": 0.02 * jax.random.normal(ks[7], (1, emb_size), jnp.float32),
        "item_bn_var": jnp.ones((1, emb_size), jnp.float32),
    }


def reference_forward(params, item_emb, item_bias):
    # Un-folded reference: exactly the PyTorch eval-mode forward.
    u = (params["user_emb"] - params["user_bn_mean"]) / jnp.sqrt(
        params["user_bn_var"] + EPS) * params["user_bn_gamma"] + params["user_bn_beta"]
    x = (item_emb - params["item_bn_mean"]) / jnp.sqrt(
        params["item_bn_var"] + EPS) * params["item_bn_gamma"] + params["item_bn_beta"]
    return (u * x).sum(axis=1) + params["bias"] + item_bias


# TODO(synk): loss() / train_model() (BCE-with-logits + AdamW loop) are host-side
# training utilities, not part of the forward pass, and are not translated.

if __name__ == "__main__":
    key = jax.random.PRNGKey(0)
    emb_size = 32

    k_p, k_emb, k_bias = jax.random.split(key, 3)
    params = init_params(k_p, emb_size)

    fwd = jax.jit(functools.partial(prediction_model_forward, force_pallas=True))

    # Primary small case (kernel path, single grid step, G = 4 lane-packing).
    n_items = 8
    item_emb = jax.random.normal(k_emb, (n_items, emb_size), jnp.float32)
    item_bias = 0.1 * jax.random.normal(k_bias, (n_items,), jnp.float32)
    preds = jax.block_until_ready(fwd(params, item_emb, item_bias))
    ref = reference_forward(params, item_emb, item_bias)
    assert preds.shape == (n_items,)
    assert jnp.allclose(preds, ref, atol=2e-5, rtol=1e-5), (preds, ref)

    # Multi-step grid with a partial (masked) last block — no jnp.pad anywhere.
    n_items2 = 1000
    k_emb2, k_bias2 = jax.random.split(k_emb)
    item_emb2 = jax.random.normal(k_emb2, (n_items2, emb_size), jnp.float32)
    item_bias2 = 0.1 * jax.random.normal(k_bias2, (n_items2,), jnp.float32)
    fwd_small_tiles = jax.jit(functools.partial(
        prediction_model_forward, force_pallas=True, tile_rows=64))
    preds2 = jax.block_until_ready(fwd_small_tiles(params, item_emb2, item_bias2))
    ref2 = reference_forward(params, item_emb2, item_bias2)
    assert jnp.allclose(preds2, ref2, atol=2e-5, rtol=1e-5)

    # Ragged N (not a multiple of 128 // E) exercises the G = 1 layout fallback.
    n_items3 = 10
    preds3 = jax.block_until_ready(
        fwd(params, item_emb2[:n_items3], item_bias2[:n_items3]))
    ref3 = reference_forward(params, item_emb2[:n_items3], item_bias2[:n_items3])
    assert jnp.allclose(preds3, ref3, atol=2e-5, rtol=1e-5)

    print("KERNEL_OK")
</pallas_src>

<mosaic_0001>
module attributes {stable_mosaic.version = 11 : i64} {
  func.func @_pred_kernel(%arg0: i32, %arg1: memref<2x128xf32, #tpu.memory_space<vmem>>, %arg2: memref<128x4xf32, #tpu.memory_space<vmem>>, %arg3: memref<2x4xf32, #tpu.memory_space<vmem>>, %arg4: memref<1x1xf32, #tpu.memory_space<smem>>, %arg5: memref<2x4xf32, #tpu.memory_space<vmem>>) attributes {dimension_semantics = [#tpu.dimension_semantics<parallel>], iteration_bounds = array<i64: 1>, scalar_prefetch = 0 : i64, scratch_operands = 0 : i64, tpu.core_type = #tpu.core_type<tc>, window_params = [{transform_indices = @transform_0, window_bounds = array<i64: 2, 128>}, {pipeline_mode = #tpu.pipeline_mode<synchronous>, transform_indices = @transform_1, window_bounds = array<i64: 128, 4>}, {transform_indices = @transform_2, window_bounds = array<i64: 2, 4>}, {transform_indices = @transform_3, window_bounds = array<i64: 1, 1>}, {transform_indices = @transform_4, window_bounds = array<i64: 2, 4>}]} {
    %c0 = arith.constant 0 : index
    %c0_0 = arith.constant 0 : index
    %0 = vector.load %arg1[%c0, %c0_0] : memref<2x128xf32, #tpu.memory_space<vmem>>, vector<2x128xf32>
    %c0_1 = arith.constant 0 : index
    %c0_2 = arith.constant 0 : index
    %1 = vector.load %arg2[%c0_1, %c0_2] : memref<128x4xf32, #tpu.memory_space<vmem>>, vector<128x4xf32>
    %cst = arith.constant dense<0.000000e+00> : vector<2x4xf32>
    %2 = tpu.matmul %0, %1, %cst {dimension_numbers = #tpu.dot_dimension_numbers<[1], [0], [0], [1], [0, 0, 1, 1], [], []>} : vector<2x128xf32>, vector<128x4xf32>, vector<2x4xf32> -> vector<2x4xf32>
    %c0_3 = arith.constant 0 : index
    %c0_4 = arith.constant 0 : index
    %3 = vector.load %arg3[%c0_3, %c0_4] : memref<2x4xf32, #tpu.memory_space<vmem>>, vector<2x4xf32>
    %4 = arith.addf %2, %3 : vector<2x4xf32>
    %c0_5 = arith.constant 0 : index
    %c0_6 = arith.constant 0 : index
    %5 = memref.load %arg4[%c0_5, %c0_6] : memref<1x1xf32, #tpu.memory_space<smem>>
    %6 = vector.broadcast %5 : f32 to vector<2x4xf32>
    %7 = arith.addf %4, %6 : vector<2x4xf32>
    %c0_7 = arith.constant 0 : index
    %c0_8 = arith.constant 0 : index
    %8 = vector.load %arg5[%c0_7, %c0_8] : memref<2x4xf32, #tpu.memory_space<vmem>>, vector<2x4xf32>
    tpu.vector_store %arg5[%c0_7, %c0_8], %7 {strides = array<i32>} : memref<2x4xf32, #tpu.memory_space<vmem>>, vector<2x4xf32>,
    return
  }
  func.func @transform_0(%arg0: i32) -> (i32, i32) {
    %c0_i32 = arith.constant 0 : i32
    %c0_i32_0 = arith.constant 0 : i32
    return %arg0, %c0_i32 : i32, i32
  }
  func.func @transform_1(%arg0: i32) -> (i32, i32) {
    %c0_i32 = arith.constant 0 : i32
    %c0_i32_0 = arith.constant 0 : i32
    %c0_i32_1 = arith.constant 0 : i32
    return %c0_i32, %c0_i32_0 : i32, i32
  }
  func.func @transform_2(%arg0: i32) -> (i32, i32) {
    %c0_i32 = arith.constant 0 : i32
    %c0_i32_0 = arith.constant 0 : i32
    return %arg0, %c0_i32 : i32, i32
  }
  func.func @transform_3(%arg0: i32) -> (i32, i32) {
    %c0_i32 = arith.constant 0 : i32
    %c0_i32_0 = arith.constant 0 : i32
    %c0_i32_1 = arith.constant 0 : i32
    return %c0_i32, %c0_i32_0 : i32, i32
  }
  func.func @transform_4(%arg0: i32) -> (i32, i32) {
    %c0_i32 = arith.constant 0 : i32
    %c0_i32_0 = arith.constant 0 : i32
    return %arg0, %c0_i32 : i32, i32
  }
}

</mosaic_0001>

<bundles_post_ra>
// kernel: prediction_model_forward.1
= control target key start
LH: loop header
LB: loop body
LE: loop exit
PB: predicated region body
PF: predicated region fallthrough
CT: control target
= control target key end

     0   :  { %v194_v0 = vmov 0.0|0.0   ;;  %vm195_vm0 = vmmov 0   ;;  %v196_v4 = vmov 0.0   ;;  %vm109_vm1 = vcmask 25600   ;;  %s282_s1 = inlined_call_operand.vmem [shape: f32[128,4], index: 1, kind: input, shape index: {}]   ;;  %s283_s0 = inlined_call_operand.vmem [shape: f32[2,128], index: 0, kind: input, shape index: {}]   ;;  %s284_s2 = inlined_call_operand.vmem [shape: f32[2,4], index: 2, kind: input, shape index: {}]   ;;  %s285_s3 = inlined_call_operand.<no memory space> [shape: f32[1,1], index: 3, kind: input, shape index: {}]   ;;  %s286_s4 = inlined_call_operand.vmem [shape: f32[2,4], index: 4, kind: output, shape index: {}]  }
   0x1   :  { %167 = vmatprep.subr.bf16.mxu0 %v194_v0  ;;  %v19_v1 = vld [vmem:[%s282_s1] sm:$0xff]  ;;  %v20_v2 = vld [vmem:[%s282_s1 + $0x8] sm:$0xff]  ;;  %v21_v3 = vld [vmem:[%s282_s1 + $0x10] sm:$0xff]  ;;  %164 = vmatprep.mubr.msk.f32.mxu0 %vm195_vm0, %v196_v4  ;;  %v107_v29 = vstv %s285_s3 }
   0x2   :  { %v168_v5 = vpack.c.bf16 %v20_v2, %v19_v1  ;;  %v22_v6 = vld [vmem:[%s282_s1 + $0x18] sm:$0xff]  ;;  %v23_v8 = vld [vmem:[%s282_s1 + $0x20] sm:$0xff]  ;;  %v24_v9 = vld [vmem:[%s282_s1 + $0x28] sm:$0xff] }
   0x3   :  { %v171_v7 = vpack.c.bf16 %v22_v6, %v21_v3  ;;  %v174_v10 = vpack.c.bf16 %v24_v9, %v23_v8  ;;  %v25_v11 = vld [vmem:[%s282_s1 + $0x30] sm:$0xff]  ;;  %v26_v12 = vld [vmem:[%s282_s1 + $0x38] sm:$0xff]  ;;  %v27_v14 = vld [vmem:[%s282_s1 + $0x40] sm:$0xff] }
   0x4   :  { %169 = vmatpush3.bf16.msra.mxu0 %v168_v5  ;;  %v177_v13 = vpack.c.bf16 %v26_v12, %v25_v11  ;;  %v28_v15 = vld [vmem:[%s282_s1 + $0x48] sm:$0xff]  ;;  %v29_v17 = vld [vmem:[%s282_s1 + $0x50] sm:$0xff]  ;;  %v30_v18 = vld [vmem:[%s282_s1 + $0x58] sm:$0xff] }
   0x5   :  { %170 = vmatprep.subr.bf16.mxu0 %v194_v0  ;;  %v180_v16 = vpack.c.bf16 %v28_v15, %v27_v14  ;;  %v183_v19 = vpack.c.bf16 %v30_v18, %v29_v17  ;;  %v31_v20 = vld [vmem:[%s282_s1 + $0x60] sm:$0xff]  ;;  %v32_v21 = vld [vmem:[%s282_s1 + $0x68] sm:$0xff]  ;;  %v33_v23 = vld [vmem:[%s282_s1 + $0x70] sm:$0xff] }
   0x6   :  { %v186_v22 = vpack.c.bf16 %v32_v21, %v31_v20  ;;  %v34_v24 = vld [vmem:[%s282_s1 + $0x78] sm:$0xff]  ;;  %v18_v26 = vld [vmem:[%s283_s0] sm:$0x3] }
   0x7   :  { %v189_v25 = vpack.c.bf16 %v34_v24, %v33_v23  ;;  %v35_v27 = vld [vmem:[%s284_s2] sm:$0x3] }
   0x8   :  { %172 = vmatpush3.bf16.msra.mxu0 %v171_v7 }
   0x9   :  { %173 = vmatprep.subr.bf16.mxu0 %v194_v0 }
   0xc   :  { %175 = vmatpush3.bf16.msra.mxu0 %v174_v10 }
   0xd   :  { %176 = vmatprep.subr.bf16.mxu0 %v194_v0 }
  0x10   :  { %178 = vmatpush3.bf16.msra.mxu0 %v177_v13 }
  0x11   :  { %179 = vmatprep.subr.bf16.mxu0 %v194_v0 }
  0x14   :  { %181 = vmatpush3.bf16.msra.mxu0 %v180_v16 }
  0x15   :  { %182 = vmatprep.subr.bf16.mxu0 %v194_v0 }
  0x18   :  { %184 = vmatpush3.bf16.msra.mxu0 %v183_v19 }
  0x19   :  { %185 = vmatprep.subr.bf16.mxu0 %v194_v0 }
  0x1c   :  { %187 = vmatpush3.bf16.msra.mxu0 %v186_v22 }
  0x1d   :  { %188 = vmatprep.subr.bf16.mxu0 %v194_v0 }
  0x20   :  { %190 = vmatpush3.bf16.msra.mxu0 %v189_v25 }
  0x23   :  { %165 = vmatmul.mubr.f32.vlgmr.msra.gmra.mrb[0].mxu0 %v18_v26 }
  0xf6   :  { %v102_v28 = vpop.f32.mrb[0].mxu0 }
  0xf7   :  { %v103_v30 = vadd.f32 %v102_v28, %v35_v27  ;;  %v166_v31 = vpop.f32.mrb[1].mxu0 }
  0xf9   :  { %v108_v32 = vadd.f32 %v107_v29, %v103_v30 }
  0xfb   :  { %110 = vst.msk [vmem:[%s286_s4] sm:$0x3] %vm109_vm1, %v108_v32 }

</bundles_post_ra>
